<compile_context>
chip_gen: v7x
topology: tpu7x:2x2x1
jax: 0.10.0
libtpu: 0.0.40
codegen_flags: <defaults>
</compile_context>

<pallas_src>
import jax
import jax.numpy as jnp
from jax.experimental import pallas as pl
from jax.experimental.pallas import tpu as pltpu

_LANES = 128          # last-dim tile (vreg lanes)
_SUBLANES = 8         # second-minor tile (vreg sublanes, f32)
_MIB = 1024 * 1024

# Use the resident-weight path while both padded bf16 weight matrices
# (single-buffered) fit in this budget; beyond it, stream W1/W2 in K-slabs.
_RESIDENT_WEIGHT_BUDGET = 40 * _MIB

# Cached result of "does this JAX accept pl.Buffered(1) on a BlockSpec?"
_WEIGHT_SINGLE_BUFFER_OK = None


def _round_up(n: int, m: int) -> int:
    return ((n + m - 1) // m) * m


# ----------------------------------------------------------------------------
# Kernels
# ----------------------------------------------------------------------------

def _resblock_resident_kernel(x_ref, w1_ref, b1_ref, w2_ref, b2_ref, o_ref):
    """o = relu(relu(x @ W1 + b1) @ W2 + b2 + x) on one (tm, Hp) batch tile.

    Matmuls use bf16 operands on the MXU with f32 accumulation; the bias adds,
    residual add and ReLUs are f32 VPU epilogues.  The residual uses the
    un-cast (f32) x so the skip connection keeps full precision.
    """
    x_f32 = x_ref[...].astype(jnp.float32)
    x_mx = x_ref[...].astype(w1_ref.dtype)            # bf16 operand for the MXU

    h = jnp.dot(x_mx, w1_ref[...], preferred_element_type=jnp.float32)
    h = jnp.maximum(h + b1_ref[...].astype(jnp.float32), 0.0)

    y = jnp.dot(h.astype(w2_ref.dtype), w2_ref[...],
                preferred_element_type=jnp.float32)
    y = y + b2_ref[...].astype(jnp.float32) + x_f32    # residual in f32
    o_ref[...] = jnp.maximum(y, 0.0).astype(o_ref.dtype)


def _resblock_streaming_kernel(x_ref, w1_ref, b1_ref, w2_ref, b2_ref, o_ref,
                               acc_ref):
    """K-streaming variant for large hidden sizes.

    grid = (batch_tiles, k_tiles).  Per k step:
      h_k   = relu(x @ W1[:, k*tk:(k+1)*tk] + b1[k*tk:(k+1)*tk])
      acc  += h_k @ W2[k*tk:(k+1)*tk, :]
    Epilogue (bias2 + residual + ReLU + cast) runs under pl.when(k == last).
    """
    k = pl.program_id(1)

    @pl.when(k == 0)
    def _():
        acc_ref[...] = jnp.zeros_like(acc_ref)

    x_mx = x_ref[...].astype(w1_ref.dtype)
    h = jnp.dot(x_mx, w1_ref[...], preferred_element_type=jnp.float32)
    h = jnp.maximum(h + b1_ref[...].astype(jnp.float32), 0.0)
    acc_ref[...] += jnp.dot(h.astype(w2_ref.dtype), w2_ref[...],
                            preferred_element_type=jnp.float32)

    @pl.when(k == pl.num_programs(1) - 1)
    def _():
        y = (acc_ref[...] + b2_ref[...].astype(jnp.float32)
             + x_ref[...].astype(jnp.float32))          # residual in f32
        o_ref[...] = jnp.maximum(y, 0.0).astype(o_ref.dtype)


# ----------------------------------------------------------------------------
# pallas_call builders
# ----------------------------------------------------------------------------

def _vmem_limit(need_bytes: int) -> int:
    return int(min(max(need_bytes, 16 * _MIB), 100 * _MIB))


def _resident_call(xp, w1p, b1p, w2p, b2p, *, tm):
    Bp, Hp = xp.shape

    def build(single_buffer_weights):
        # Constant-index weight/bias blocks stay VMEM-resident across batch
        # tiles; single-buffering them halves their footprint (there is
        # nothing to pipeline for a constant index_map).
        wmode = ({"pipeline_mode": pl.Buffered(1)}
                 if single_buffer_weights else {})
        in_specs = [
            pl.BlockSpec((tm, Hp), lambda i: (i, 0)),            # x (batch-tiled)
            pl.BlockSpec((Hp, Hp), lambda i: (0, 0), **wmode),   # W1 (resident)
            pl.BlockSpec((1, Hp), lambda i: (0, 0), **wmode),    # b1
            pl.BlockSpec((Hp, Hp), lambda i: (0, 0), **wmode),   # W2 (resident)
            pl.BlockSpec((1, Hp), lambda i: (0, 0), **wmode),    # b2
        ]
        w_bufs = 1 if single_buffer_weights else 2
        need = (w_bufs * 2 * Hp * Hp * w1p.dtype.itemsize   # W1 + W2
                + 2 * 2 * tm * Hp * xp.dtype.itemsize       # x + out, 2 bufs each
                + 4 * Hp * 4                                # biases
                + 2 * _MIB)                                 # headroom
        return pl.pallas_call(
            _resblock_resident_kernel,
            out_shape=jax.ShapeDtypeStruct((Bp, Hp), xp.dtype),
            grid=(Bp // tm,),
            in_specs=in_specs,
            out_specs=pl.BlockSpec((tm, Hp), lambda i: (i, 0)),
            compiler_params=pltpu.CompilerParams(
                dimension_semantics=("parallel",),   # shard batch tiles on v7x
                vmem_limit_bytes=_vmem_limit(need),
            ),
        )

    global _WEIGHT_SINGLE_BUFFER_OK
    if _WEIGHT_SINGLE_BUFFER_OK is None:
        try:
            out = build(True)(xp, w1p, b1p, w2p, b2p)
            _WEIGHT_SINGLE_BUFFER_OK = True
            return out
        except Exception:
            # pipeline_mode not supported by this build -> plain double-buffer.
            _WEIGHT_SINGLE_BUFFER_OK = False
    return build(_WEIGHT_SINGLE_BUFFER_OK)(xp, w1p, b1p, w2p, b2p)


def _streaming_call(xp, w1p, b1p, w2p, b2p, *, tm, tk=None):
    Bp, Hp = xp.shape
    if tk is None:
        tk = 512
    # largest multiple of 128 that divides Hp and is <= requested tk
    chosen = _LANES
    for cand in range(min(_round_up(tk, _LANES), Hp), 0, -_LANES):
        if Hp % cand == 0:
            chosen = cand
            break
    tk = chosen

    in_specs = [
        pl.BlockSpec((tm, Hp), lambda i, k: (i, 0)),   # x: full row, reused over k
        pl.BlockSpec((Hp, tk), lambda i, k: (0, k)),   # W1 column slab
        pl.BlockSpec((1, tk), lambda i, k: (0, k)),    # b1 slab
        pl.BlockSpec((tk, Hp), lambda i, k: (k, 0)),   # W2 row slab
        pl.BlockSpec((1, Hp), lambda i, k: (0, 0)),    # b2
    ]
    need = (2 * 2 * Hp * tk * w1p.dtype.itemsize       # W1/W2 slabs, 2 bufs each
            + 2 * 2 * tm * Hp * xp.dtype.itemsize      # x + out, 2 bufs each
            + tm * Hp * 4                              # f32 accumulator scratch
            + 4 * Hp * 4 + 2 * _MIB)
    return pl.pallas_call(
        _resblock_streaming_kernel,
        out_shape=jax.ShapeDtypeStruct((Bp, Hp), xp.dtype),
        grid=(Bp // tm, Hp // tk),
        in_specs=in_specs,
        out_specs=pl.BlockSpec((tm, Hp), lambda i, k: (i, 0)),
        scratch_shapes=[pltpu.VMEM((tm, Hp), jnp.float32)],
        compiler_params=pltpu.CompilerParams(
            dimension_semantics=("parallel", "arbitrary"),
            vmem_limit_bytes=_vmem_limit(need),
        ),
    )(xp, w1p, b1p, w2p, b2p)


# ----------------------------------------------------------------------------
# Parameter preparation + forward wrapper
# ----------------------------------------------------------------------------

def prepare_resblock_params(w1, b1, w2, b2, *, matmul_dtype=jnp.bfloat16):
    """Pad / cast the ResBlock parameters ONCE (not per forward call).

    w1, w2 : (H, H) in (in, out) layout (transpose of torch nn.Linear.weight)
    b1, b2 : (H,)
    Weights are zero-padded to (Hp, Hp), Hp = round_up(H, 128), and cast to
    `matmul_dtype` (bf16 by default -> native MXU path).  Biases are kept f32.
    """
    H = w1.shape[0]
    assert w1.shape == (H, H) and w2.shape == (H, H)
    assert b1.shape == (H,) and b2.shape == (H,)
    Hp = _round_up(H, _LANES)
    w1p = jnp.zeros((Hp, Hp), matmul_dtype).at[:H, :H].set(w1.astype(matmul_dtype))
    w2p = jnp.zeros((Hp, Hp), matmul_dtype).at[:H, :H].set(w2.astype(matmul_dtype))
    b1p = jnp.zeros((1, Hp), jnp.float32).at[0, :H].set(b1.astype(jnp.float32))
    b2p = jnp.zeros((1, Hp), jnp.float32).at[0, :H].set(b2.astype(jnp.float32))
    return {"H": H, "Hp": Hp, "w1": w1p, "b1": b1p, "w2": w2p, "b2": b2p}


def resblock_forward(x, params, *, block_rows=None, block_k=None,
                     force_streaming=False):
    """ResBlock forward.  x: (B, H) f32, params from prepare_resblock_params."""
    H, Hp = params["H"], params["Hp"]
    w1p, b1p, w2p, b2p = params["w1"], params["b1"], params["w2"], params["b2"]
    B = x.shape[0]
    assert x.ndim == 2 and x.shape[1] == H

    # --- batch tile selection ---------------------------------------------
    Bp = _round_up(B, _SUBLANES)
    if block_rows is None:
        # Small H -> HBM-bound on streaming x/out: bigger tile amortizes the
        # ~0.35us per-step overhead and the one-time weight load.
        block_rows = 512 if Hp <= 512 else 256
    tm = _round_up(min(block_rows, Bp), _SUBLANES)
    # v7x has 2 TensorCores: make sure the "parallel" batch axis has >= 2
    # tiles when the batch allows it (no-op on single-TC v5e/v6e).
    if Bp // tm < 2 and Bp >= 2 * _SUBLANES:
        tm = _round_up(Bp // 2, _SUBLANES)
    Bp = _round_up(Bp, tm)

    # --- pad x only when actually needed ------------------------------------
    if (Bp, Hp) != (B, H):
        xp = jnp.zeros((Bp, Hp), x.dtype).at[:B, :H].set(x)
    else:
        xp = x

    weight_bytes = 2 * Hp * Hp * w1p.dtype.itemsize
    use_streaming = force_streaming or weight_bytes > _RESIDENT_WEIGHT_BUDGET

    if use_streaming:
        out = _streaming_call(xp, w1p, b1p, w2p, b2p, tm=tm, tk=block_k)
    else:
        out = _resident_call(xp, w1p, b1p, w2p, b2p, tm=tm)

    if (Bp, Hp) != (B, H):
        out = out[:B, :H]
    return out


def init_resblock_params(key, hidden_dim: int, dtype=jnp.float32):
    """nn.Linear-style U(-1/sqrt(H), 1/sqrt(H)) init; weights stored (in, out)."""
    k1, k2, k3, k4 = jax.random.split(key, 4)
    scale = 1.0 / jnp.sqrt(hidden_dim)
    w1 = jax.random.uniform(k1, (hidden_dim, hidden_dim), dtype, -scale, scale)
    b1 = jax.random.uniform(k2, (hidden_dim,), dtype, -scale, scale)
    w2 = jax.random.uniform(k3, (hidden_dim, hidden_dim), dtype, -scale, scale)
    b2 = jax.random.uniform(k4, (hidden_dim,), dtype, -scale, scale)
    return w1, b1, w2, b2


def _resblock_reference(x, w1, b1, w2, b2):
    h = jnp.maximum(x @ w1 + b1, 0.0)
    return jnp.maximum(h @ w2 + b2 + x, 0.0)


if __name__ == "__main__":
    key = jax.random.PRNGKey(0)
    k_p1, k_x1, k_p2, k_x2 = jax.random.split(key, 4)

    # --- primary small-shape check ------------------------------------------
    hidden_dim, batch = 32, 2
    w1, b1, w2, b2 = init_resblock_params(k_p1, hidden_dim)
    params = prepare_resblock_params(w1, b1, w2, b2)
    x = jax.random.normal(k_x1, (batch, hidden_dim), jnp.float32)

    out = jax.block_until_ready(resblock_forward(x, params))
    ref = _resblock_reference(x, w1, b1, w2, b2)
    assert out.shape == (batch, hidden_dim)
    # bf16 MXU operands -> relax tolerance vs. the f32 reference.
    assert jnp.allclose(out, ref, atol=2e-2, rtol=2e-2), float(
        jnp.max(jnp.abs(out - ref)))

    # --- exercise the multi-tile batch grid and the K-streaming path --------
    hidden_dim2, batch2 = 256, 16
    w1b, b1b, w2b, b2b = init_resblock_params(k_p2, hidden_dim2)
    params2 = prepare_resblock_params(w1b, b1b, w2b, b2b)
    x2 = jax.random.normal(k_x2, (batch2, hidden_dim2), jnp.float32)
    ref2 = _resblock_reference(x2, w1b, b1b, w2b, b2b)

    out2 = jax.block_until_ready(resblock_forward(x2, params2))
    assert jnp.allclose(out2, ref2, atol=2e-2, rtol=2e-2), float(
        jnp.max(jnp.abs(out2 - ref2)))

    out3 = jax.block_until_ready(
        resblock_forward(x2, params2, force_streaming=True, block_k=128))
    assert jnp.allclose(out3, ref2, atol=2e-2, rtol=2e-2), float(
        jnp.max(jnp.abs(out3 - ref2)))

    print("KERNEL_OK")
</pallas_src>

<mosaic_0001>
module attributes {stable_mosaic.version = 11 : i64} {
  func.func @_resblock_resident_kernel(%arg0: i32, %arg1: memref<8x128xf32, #tpu.memory_space<vmem>>, %arg2: memref<128x128xbf16, #tpu.memory_space<vmem>>, %arg3: memref<1x128xf32, #tpu.memory_space<vmem>>, %arg4: memref<128x128xbf16, #tpu.memory_space<vmem>>, %arg5: memref<1x128xf32, #tpu.memory_space<vmem>>, %arg6: memref<8x128xf32, #tpu.memory_space<vmem>>) attributes {dimension_semantics = [#tpu.dimension_semantics<parallel>], iteration_bounds = array<i64: 1>, scalar_prefetch = 0 : i64, scratch_operands = 0 : i64, tpu.core_type = #tpu.core_type<tc>, window_params = [{transform_indices = @transform_0, window_bounds = array<i64: 8, 128>}, {pipeline_mode = #tpu.pipeline_mode<synchronous>, transform_indices = @transform_1, window_bounds = array<i64: 128, 128>}, {pipeline_mode = #tpu.pipeline_mode<synchronous>, transform_indices = @transform_2, window_bounds = array<i64: 1, 128>}, {pipeline_mode = #tpu.pipeline_mode<synchronous>, transform_indices = @transform_3, window_bounds = array<i64: 128, 128>}, {pipeline_mode = #tpu.pipeline_mode<synchronous>, transform_indices = @transform_4, window_bounds = array<i64: 1, 128>}, {transform_indices = @transform_5, window_bounds = array<i64: 8, 128>}]} {
    %c0 = arith.constant 0 : index
    %c0_0 = arith.constant 0 : index
    %0 = vector.load %arg1[%c0, %c0_0] : memref<8x128xf32, #tpu.memory_space<vmem>>, vector<8x128xf32>
    %c0_1 = arith.constant 0 : index
    %c0_2 = arith.constant 0 : index
    %1 = vector.load %arg1[%c0_1, %c0_2] : memref<8x128xf32, #tpu.memory_space<vmem>>, vector<8x128xf32>
    %2 = arith.truncf %1 : vector<8x128xf32> to vector<8x128xbf16>
    %c0_3 = arith.constant 0 : index
    %c0_4 = arith.constant 0 : index
    %3 = vector.load %arg2[%c0_3, %c0_4] : memref<128x128xbf16, #tpu.memory_space<vmem>>, vector<128x128xbf16>
    %cst = arith.constant dense<0.000000e+00> : vector<8x128xf32>
    %4 = tpu.matmul %2, %3, %cst {dimension_numbers = #tpu.dot_dimension_numbers<[1], [0], [0], [1], [0, 0, 1, 1], [], []>} : vector<8x128xbf16>, vector<128x128xbf16>, vector<8x128xf32> -> vector<8x128xf32>
    %c0_5 = arith.constant 0 : index
    %c0_6 = arith.constant 0 : index
    %5 = vector.load %arg3[%c0_5, %c0_6] : memref<1x128xf32, #tpu.memory_space<vmem>>, vector<1x128xf32>
    %6 = vector.broadcast %5 : vector<1x128xf32> to vector<8x128xf32>
    %7 = arith.addf %4, %6 : vector<8x128xf32>
    %cst_7 = arith.constant 0.000000e+00 : f32
    %8 = vector.broadcast %cst_7 : f32 to vector<8x128xf32>
    %9 = arith.maximumf %7, %8 : vector<8x128xf32>
    %10 = arith.truncf %9 : vector<8x128xf32> to vector<8x128xbf16>
    %c0_8 = arith.constant 0 : index
    %c0_9 = arith.constant 0 : index
    %11 = vector.load %arg4[%c0_8, %c0_9] : memref<128x128xbf16, #tpu.memory_space<vmem>>, vector<128x128xbf16>
    %cst_10 = arith.constant dense<0.000000e+00> : vector<8x128xf32>
    %12 = tpu.matmul %10, %11, %cst_10 {dimension_numbers = #tpu.dot_dimension_numbers<[1], [0], [0], [1], [0, 0, 1, 1], [], []>} : vector<8x128xbf16>, vector<128x128xbf16>, vector<8x128xf32> -> vector<8x128xf32>
    %c0_11 = arith.constant 0 : index
    %c0_12 = arith.constant 0 : index
    %13 = vector.load %arg5[%c0_11, %c0_12] : memref<1x128xf32, #tpu.memory_space<vmem>>, vector<1x128xf32>
    %14 = vector.broadcast %13 : vector<1x128xf32> to vector<8x128xf32>
    %15 = arith.addf %12, %14 : vector<8x128xf32>
    %16 = arith.addf %15, %0 : vector<8x128xf32>
    %cst_13 = arith.constant 0.000000e+00 : f32
    %17 = vector.broadcast %cst_13 : f32 to vector<8x128xf32>
    %18 = arith.maximumf %16, %17 : vector<8x128xf32>
    %c0_14 = arith.constant 0 : index
    %c0_15 = arith.constant 0 : index
    %19 = vector.load %arg6[%c0_14, %c0_15] : memref<8x128xf32, #tpu.memory_space<vmem>>, vector<8x128xf32>
    tpu.vector_store %arg6[%c0_14, %c0_15], %18 {strides = array<i32>} : memref<8x128xf32, #tpu.memory_space<vmem>>, vector<8x128xf32>,
    return
  }
  func.func @transform_0(%arg0: i32) -> (i32, i32) {
    %c0_i32 = arith.constant 0 : i32
    %c0_i32_0 = arith.constant 0 : i32
    return %arg0, %c0_i32 : i32, i32
  }
  func.func @transform_1(%arg0: i32) -> (i32, i32) {
    %c0_i32 = arith.constant 0 : i32
    %c0_i32_0 = arith.constant 0 : i32
    %c0_i32_1 = arith.constant 0 : i32
    return %c0_i32, %c0_i32_0 : i32, i32
  }
  func.func @transform_2(%arg0: i32) -> (i32, i32) {
    %c0_i32 = arith.constant 0 : i32
    %c0_i32_0 = arith.constant 0 : i32
    %c0_i32_1 = arith.constant 0 : i32
    return %c0_i32, %c0_i32_0 : i32, i32
  }
  func.func @transform_3(%arg0: i32) -> (i32, i32) {
    %c0_i32 = arith.constant 0 : i32
    %c0_i32_0 = arith.constant 0 : i32
    %c0_i32_1 = arith.constant 0 : i32
    return %c0_i32, %c0_i32_0 : i32, i32
  }
  func.func @transform_4(%arg0: i32) -> (i32, i32) {
    %c0_i32 = arith.constant 0 : i32
    %c0_i32_0 = arith.constant 0 : i32
    %c0_i32_1 = arith.constant 0 : i32
    return %c0_i32, %c0_i32_0 : i32, i32
  }
  func.func @transform_5(%arg0: i32) -> (i32, i32) {
    %c0_i32 = arith.constant 0 : i32
    %c0_i32_0 = arith.constant 0 : i32
    return %arg0, %c0_i32 : i32, i32
  }
}

module attributes {stable_mosaic.version = 11 : i64} {
  func.func @_resblock_resident_kernel(%arg0: i32, %arg1: memref<8x128xf32, #tpu.memory_space<vmem>>, %arg2: memref<128x128xbf16, #tpu.memory_space<vmem>>, %arg3: memref<1x128xf32, #tpu.memory_space<vmem>>, %arg4: memref<128x128xbf16, #tpu.memory_space<vmem>>, %arg5: memref<1x128xf32, #tpu.memory_space<vmem>>, %arg6: memref<8x128xf32, #tpu.memory_space<vmem>>) attributes {dimension_semantics = [#tpu.dimension_semantics<parallel>], iteration_bounds = array<i64: 1>, scalar_prefetch = 0 : i64, scratch_operands = 0 : i64, tpu.core_type = #tpu.core_type<tc>, window_params = [{transform_indices = @transform_0, window_bounds = array<i64: 8, 128>}, {pipeline_mode = #tpu.pipeline_mode<synchronous>, transform_indices = @transform_1, window_bounds = array<i64: 128, 128>}, {pipeline_mode = #tpu.pipeline_mode<synchronous>, transform_indices = @transform_2, window_bounds = array<i64: 1, 128>}, {pipeline_mode = #tpu.pipeline_mode<synchronous>, transform_indices = @transform_3, window_bounds = array<i64: 128, 128>}, {pipeline_mode = #tpu.pipeline_mode<synchronous>, transform_indices = @transform_4, window_bounds = array<i64: 1, 128>}, {transform_indices = @transform_5, window_bounds = array<i64: 8, 128>}]} {
    %c0 = arith.constant 0 : index
    %c0_0 = arith.constant 0 : index
    %0 = vector.load %arg1[%c0, %c0_0] : memref<8x128xf32, #tpu.memory_space<vmem>>, vector<8x128xf32>
    %c0_1 = arith.constant 0 : index
    %c0_2 = arith.constant 0 : index
    %1 = vector.load %arg1[%c0_1, %c0_2] : memref<8x128xf32, #tpu.memory_space<vmem>>, vector<8x128xf32>
    %2 = arith.truncf %1 : vector<8x128xf32> to vector<8x128xbf16>
    %c0_3 = arith.constant 0 : index
    %c0_4 = arith.constant 0 : index
    %3 = vector.load %arg2[%c0_3, %c0_4] : memref<128x128xbf16, #tpu.memory_space<vmem>>, vector<128x128xbf16>
    %cst = arith.constant dense<0.000000e+00> : vector<8x128xf32>
    %4 = tpu.matmul %2, %3, %cst {dimension_numbers = #tpu.dot_dimension_numbers<[1], [0], [0], [1], [0, 0, 1, 1], [], []>} : vector<8x128xbf16>, vector<128x128xbf16>, vector<8x128xf32> -> vector<8x128xf32>
    %c0_5 = arith.constant 0 : index
    %c0_6 = arith.constant 0 : index
    %5 = vector.load %arg3[%c0_5, %c0_6] : memref<1x128xf32, #tpu.memory_space<vmem>>, vector<1x128xf32>
    %6 = vector.broadcast %5 : vector<1x128xf32> to vector<8x128xf32>
    %7 = arith.addf %4, %6 : vector<8x128xf32>
    %cst_7 = arith.constant 0.000000e+00 : f32
    %8 = vector.broadcast %cst_7 : f32 to vector<8x128xf32>
    %9 = arith.maximumf %7, %8 : vector<8x128xf32>
    %10 = arith.truncf %9 : vector<8x128xf32> to vector<8x128xbf16>
    %c0_8 = arith.constant 0 : index
    %c0_9 = arith.constant 0 : index
    %11 = vector.load %arg4[%c0_8, %c0_9] : memref<128x128xbf16, #tpu.memory_space<vmem>>, vector<128x128xbf16>
    %cst_10 = arith.constant dense<0.000000e+00> : vector<8x128xf32>
    %12 = tpu.matmul %10, %11, %cst_10 {dimension_numbers = #tpu.dot_dimension_numbers<[1], [0], [0], [1], [0, 0, 1, 1], [], []>} : vector<8x128xbf16>, vector<128x128xbf16>, vector<8x128xf32> -> vector<8x128xf32>
    %c0_11 = arith.constant 0 : index
    %c0_12 = arith.constant 0 : index
    %13 = vector.load %arg5[%c0_11, %c0_12] : memref<1x128xf32, #tpu.memory_space<vmem>>, vector<1x128xf32>
    %14 = vector.broadcast %13 : vector<1x128xf32> to vector<8x128xf32>
    %15 = arith.addf %12, %14 : vector<8x128xf32>
    %16 = arith.addf %15, %0 : vector<8x128xf32>
    %cst_13 = arith.constant 0.000000e+00 : f32
    %17 = vector.broadcast %cst_13 : f32 to vector<8x128xf32>
    %18 = arith.maximumf %16, %17 : vector<8x128xf32>
    %c0_14 = arith.constant 0 : index
    %c0_15 = arith.constant 0 : index
    %19 = vector.load %arg6[%c0_14, %c0_15] : memref<8x128xf32, #tpu.memory_space<vmem>>, vector<8x128xf32>
    tpu.vector_store %arg6[%c0_14, %c0_15], %18 {strides = array<i32>} : memref<8x128xf32, #tpu.memory_space<vmem>>, vector<8x128xf32>,
    return
  }
  func.func @transform_0(%arg0: i32) -> (i32, i32) {
    %c0_i32 = arith.constant 0 : i32
    %c0_i32_0 = arith.constant 0 : i32
    return %arg0, %c0_i32 : i32, i32
  }
  func.func @transform_1(%arg0: i32) -> (i32, i32) {
    %c0_i32 = arith.constant 0 : i32
    %c0_i32_0 = arith.constant 0 : i32
    %c0_i32_1 = arith.constant 0 : i32
    return %c0_i32, %c0_i32_0 : i32, i32
  }
  func.func @transform_2(%arg0: i32) -> (i32, i32) {
    %c0_i32 = arith.constant 0 : i32
    %c0_i32_0 = arith.constant 0 : i32
    %c0_i32_1 = arith.constant 0 : i32
    return %c0_i32, %c0_i32_0 : i32, i32
  }
  func.func @transform_3(%arg0: i32) -> (i32, i32) {
    %c0_i32 = arith.constant 0 : i32
    %c0_i32_0 = arith.constant 0 : i32
    %c0_i32_1 = arith.constant 0 : i32
    return %c0_i32, %c0_i32_0 : i32, i32
  }
  func.func @transform_4(%arg0: i32) -> (i32, i32) {
    %c0_i32 = arith.constant 0 : i32
    %c0_i32_0 = arith.constant 0 : i32
    %c0_i32_1 = arith.constant 0 : i32
    return %c0_i32, %c0_i32_0 : i32, i32
  }
  func.func @transform_5(%arg0: i32) -> (i32, i32) {
    %c0_i32 = arith.constant 0 : i32
    %c0_i32_0 = arith.constant 0 : i32
    return %arg0, %c0_i32 : i32, i32
  }
}

</mosaic_0001>

<bundles_post_ra>
// kernel: tpu_custom_call.1
= control target key start
LH: loop header
LB: loop body
LE: loop exit
PB: predicated region body
PF: predicated region fallthrough
CT: control target
= control target key end

     0   :  { %10 = vsyncpa [#allocation3], 0  ;;  %s598_s0 = inlined_call_operand.hbm [shape: f32[8,128], index: 0, kind: input, shape index: {}]   ;;  %s599_s1 = inlined_call_operand.hbm [shape: bf16[128,128], index: 1, kind: input, shape index: {}]   ;;  %s600_s2 = inlined_call_operand.vmem [shape: f32[1,128], index: 2, kind: input, shape index: {}]   ;;  %s601_s3 = inlined_call_operand.hbm [shape: bf16[128,128], index: 3, kind: input, shape index: {}]   ;;  %s602_s4 = inlined_call_operand.vmem [shape: f32[1,128], index: 4, kind: input, shape index: {}]   ;;  %s603_s5 = inlined_call_operand.hbm [shape: f32[8,128], index: 5, kind: output, shape index: {}]  }
   0x1   :  { %11 = vsyncpa [#allocation6], 0 }
   0x2   :  { %12 = vsyncpa [#allocation4], 0  ;;  %s500_s18 = smov [#allocation5]   ;;  %s406_s22 = scalar_lea.hbm %s599_s1, 1024 }
   0x3   :  { %s28_s19 = sshll.u32 %s500_s18, 4  ;;  %p407_p0 = scmp.ne.s32.totalorder %s599_s1, %s406_s22  ;;  %s29_s19 = int_to_ptr.vmem [resolvable:$true] %s28_s19 }
   0x4   :  { %p410_p1 = scmp.lt.u32.totalorder %s406_s22, %s599_s1 }
   0x6   :  { %p412_p2 = pnand %p410_p1, %p407_p0 }
   0x8   :  { %415 = shalt.err (!%p412_p2)
}
   0x9   :  { %s416_s27 = scalar_lea.vmem %s29_s19, 1024  ;;  %p421_p4 = scmp.lt.s32.totalorder %s29_s19, %s29_s19 }
   0xa   :  { %p417_p3 = scmp.ne.s32.totalorder %s29_s19, %s416_s27  ;;  %p422_p5 = scmp.lt.s32.totalorder %s416_s27, %s416_s27 }
   0xc   :  { %p423_p6 = por %p422_p5, %p421_p4 }
   0xe   :  { %p424_p7 = pnand %p423_p6, %p417_p3 }
  0x10   :  { %427 = shalt.err (!%p424_p7)
}
  0x11   :  { %s501_s28 = smov 64   ;;  %s502_s29 = smov 4  }
  0x12   :  { %34 = dma.hbm_to_vmem [thread:$0]  %s599_s1, 1024, %s29_s19, [#allocation6], %s501_s28, %s501_s28, %s502_s29  }
  0x13   :  { %s503_s7 = smov [#allocation2]   ;;  %s504_s9 = smov [#allocation7]  }
  0x14   :  { %s19_s8 = sshll.u32 %s503_s7, 4  ;;  %s42_s10 = sshll.u32 %s504_s9, 4  ;;  %s20_s8 = int_to_ptr.vmem [resolvable:$true] %s19_s8  ;;  %s43_s10 = int_to_ptr.vmem [resolvable:$true] %s42_s10 }
  0x15   :  { %s428_s13 = scalar_lea.hbm %s598_s0, 128 }
  0x16   :  { %p429_p8 = scmp.ne.s32.totalorder %s598_s0, %s428_s13  ;;  %p432_p9 = scmp.lt.u32.totalorder %s428_s13, %s598_s0 }
  0x18   :  { %p434_p10 = pnand %p432_p9, %p429_p8 }
  0x1a   :  { %437 = shalt.err (!%p434_p10)
}
  0x1b   :  { %s438_s1 = scalar_lea.vmem %s20_s8, 128  ;;  %p443_p12 = scmp.lt.s32.totalorder %s20_s8, %s20_s8 }
  0x1c   :  { %p439_p11 = scmp.ne.s32.totalorder %s20_s8, %s438_s1  ;;  %p444_p13 = scmp.lt.s32.totalorder %s438_s1, %s438_s1 }
  0x1e   :  { %p445_p0 = por %p444_p13, %p443_p12 }
  0x20   :  { %p446_p1 = pnand %p445_p0, %p439_p11 }
  0x22   :  { %449 = shalt.err (!%p446_p1)
}
  0x23   :  { %22 = dma.hbm_to_vmem [thread:$0]  %s598_s0, 128, %s20_s8, [#allocation3]  }
  0x24   :  { %s450_s22 = scalar_lea.hbm %s601_s3, 1024 }
  0x25   :  { %p451_p2 = scmp.ne.s32.totalorder %s601_s3, %s450_s22  ;;  %p454_p3 = scmp.lt.u32.totalorder %s450_s22, %s601_s3 }
  0x27   :  { %p456_p4 = pnand %p454_p3, %p451_p2 }
  0x29   :  { %459 = shalt.err (!%p456_p4)
}
  0x2a   :  { %s460_s27 = scalar_lea.vmem %s43_s10, 1024  ;;  %p465_p6 = scmp.lt.s32.totalorder %s43_s10, %s43_s10 }
  0x2b   :  { %p461_p5 = scmp.ne.s32.totalorder %s43_s10, %s460_s27  ;;  %p466_p7 = scmp.lt.s32.totalorder %s460_s27, %s460_s27 }
  0x2d   :  { %p467_p8 = por %p466_p7, %p465_p6 }
  0x2f   :  { %p468_p9 = pnand %p467_p8, %p461_p5 }
  0x31   :  { %471 = shalt.err (!%p468_p9)
}
  0x32   :  { %48 = dma.hbm_to_vmem [thread:$0]  %s601_s3, 1024, %s43_s10, [#allocation6], %s501_s28, %s501_s28, %s502_s29  }
  0x33   :  { %494 = dma.done.wait [#allocation3], 128  }
  0x34   :  { %495 = vsyncadd [#allocation3], 4294967168 }
  0x35   :  { %496 = dma.done.wait [#allocation6], 2048  }
  0x36   :  { %497 = vsyncadd [#allocation6], 4294965248  ;;  %v505_v0 = vmov 0.0   ;;  %vm506_vm0 = vmmov 0   ;;  %v390_v1 = vld [vmem:[#allocation5] sm:$0xff]   ;;  %v391_v2 = vld [vmem:[#allocation5 + $0x8] sm:$0xff]  }
  0x37   :  { %342 = vmatprep.subr.bf16.mxu0 %v505_v0  ;;  %358 = vmatprep.mubr.msk.bf16.mxu0 %vm506_vm0, %v505_v0  ;;  %v392_v3 = vld [vmem:[#allocation5 + $0x10] sm:$0xff]   ;;  %v398_v4 = vld [vmem:[#allocation7] sm:$0xff]   ;;  %v393_v5 = vld [vmem:[#allocation5 + $0x18] sm:$0xff]   ;;  %s507_s7 = smov [#allocation8]  }
  0x38   :  { %362 = vmatprep.subr.bf16.mxu1 %v505_v0  ;;  %378 = vmatprep.mubr.msk.bf16.mxu1 %vm506_vm0, %v505_v0  ;;  %v399_v6 = vld [vmem:[#allocation7 + $0x8] sm:$0xff]   ;;  %v394_v7 = vld [vmem:[#allocation5 + $0x20] sm:$0xff]   ;;  %v400_v8 = vld [vmem:[#allocation7 + $0x10] sm:$0xff]   ;;  %s296_s8 = sshll.u32 %s507_s7, 4  ;;  %s297_s8 = int_to_ptr.vmem [resolvable:$true] %s296_s8 }
  0x39   :  { %343 = vmatpush3.bf16.msra.mxu0 %v390_v1  ;;  %363 = vmatpush3.bf16.msra.mxu1 %v398_v4  ;;  %v395_v9 = vld [vmem:[#allocation5 + $0x28] sm:$0xff]   ;;  %v401_v10 = vld [vmem:[#allocation7 + $0x18] sm:$0xff]   ;;  %v396_v11 = vld [vmem:[#allocation5 + $0x30] sm:$0xff]   ;;  %p477_p11 = scmp.lt.s32.totalorder %s297_s8, %s297_s8 }
  0x3a   :  { %344 = vmatprep.subr.bf16.mxu0 %v505_v0  ;;  %364 = vmatprep.subr.bf16.mxu1 %v505_v0  ;;  %v402_v12 = vld [vmem:[#allocation7 + $0x20] sm:$0xff]   ;;  %v397_v13 = vld [vmem:[#allocation5 + $0x38] sm:$0xff]   ;;  %v403_v15 = vld [vmem:[#allocation7 + $0x28] sm:$0xff]  }
  0x3b   :  { %v61_v14 = vld [vmem:[#allocation2] sm:$0xff]  ;;  %v404_v17 = vld [vmem:[#allocation7 + $0x30] sm:$0xff]  }
  0x3c   :  { %v62_v16 = vpack.c.bf16 %v61_v14, %v61_v14  ;;  %v405_v18 = vld [vmem:[#allocation7 + $0x38] sm:$0xff]  }
  0x3d   :  { %345 = vmatpush3.bf16.msra.mxu0 %v391_v2  ;;  %365 = vmatpush3.bf16.msra.mxu1 %v399_v6  ;;  %v306_v19 = vld [vmem:[%s600_s2] ss:$0 sm:$0xff]  ;;  %s472_s2 = scalar_lea.vmem %s297_s8, 128 }
  0x3e   :  { %346 = vmatprep.subr.bf16.mxu0 %v505_v0  ;;  %366 = vmatprep.subr.bf16.mxu1 %v505_v0  ;;  %v315_v27 = vld [vmem:[%s602_s4] ss:$0 sm:$0xff]  ;;  %p473_p10 = scmp.ne.s32.totalorder %s297_s8, %s472_s2  ;;  %p478_p12 = scmp.lt.s32.totalorder %s472_s2, %s472_s2 }
  0x40   :  { %p479_p13 = por %p478_p12, %p477_p11 }
  0x41   :  { %347 = vmatpush3.bf16.msra.mxu0 %v392_v3  ;;  %367 = vmatpush3.bf16.msra.mxu1 %v400_v8 }
  0x42   :  { %348 = vmatprep.subr.bf16.mxu0 %v505_v0  ;;  %368 = vmatprep.subr.bf16.mxu1 %v505_v0  ;;  %p480_p0 = pnand %p479_p13, %p473_p10 }
  0x45   :  { %349 = vmatpush3.bf16.msra.mxu0 %v393_v5  ;;  %369 = vmatpush3.bf16.msra.mxu1 %v401_v10 }
  0x46   :  { %350 = vmatprep.subr.bf16.mxu0 %v505_v0  ;;  %370 = vmatprep.subr.bf16.mxu1 %v505_v0 }
  0x49   :  { %351 = vmatpush3.bf16.msra.mxu0 %v394_v7  ;;  %371 = vmatpush3.bf16.msra.mxu1 %v402_v12 }
  0x4a   :  { %352 = vmatprep.subr.bf16.mxu0 %v505_v0  ;;  %372 = vmatprep.subr.bf16.mxu1 %v505_v0 }
  0x4d   :  { %353 = vmatpush3.bf16.msra.mxu0 %v395_v9  ;;  %373 = vmatpush3.bf16.msra.mxu1 %v403_v15 }
  0x4e   :  { %354 = vmatprep.subr.bf16.mxu0 %v505_v0  ;;  %374 = vmatprep.subr.bf16.mxu1 %v505_v0 }
  0x51   :  { %355 = vmatpush3.bf16.msra.mxu0 %v396_v11  ;;  %375 = vmatpush3.bf16.msra.mxu1 %v404_v17 }
  0x52   :  { %356 = vmatprep.subr.bf16.mxu0 %v505_v0  ;;  %376 = vmatprep.subr.bf16.mxu1 %v505_v0 }
  0x55   :  { %357 = vmatpush3.bf16.msra.mxu0 %v397_v13  ;;  %377 = vmatpush3.bf16.msra.mxu1 %v405_v18 }
  0x58   :  { %359 = vmatmul.mubr.bf16.vlgmr.msra.gmra.mrb[0].mxu0 %v62_v16 }
 0x12b   :  { %v168_v20 = vpop.f32.mrb[0].mxu0 }
 0x12c   :  { %v169_v21 = vadd.f32 %v306_v19, %v168_v20  ;;  %v360_v22 = vpop.f32.mrb[1].mxu0 }
 0x12d   :  { %v171_v23 = vpop.f32.mrb[2].mxu0 }
 0x12e   :  { %v174_v24 = vmax.f32 %v169_v21, 0.0  ;;  %v361_v25 = vpop.f32.mrb[3].mxu0 }
 0x130   :  { %v175_v26 = vpack.c.bf16 %v174_v24, %v174_v24 }
 0x132   :  { %379 = vmatmul.mubr.bf16.vlgmr.msra.gmra.mrb[0].mxu1 %v175_v26 }
 0x205   :  { %v281_v28 = vpop.f32.mrb[0].mxu1 }
 0x206   :  { %v282_v29 = vadd.f32 %v315_v27, %v281_v28  ;;  %v380_v30 = vpop.f32.mrb[1].mxu1 }
 0x207   :  { %v284_v31 = vpop.f32.mrb[2].mxu1 }
 0x208   :  { %v287_v32 = vadd.f32 %v282_v29, %v61_v14  ;;  %v381_v33 = vpop.f32.mrb[3].mxu1 }
 0x20a   :  { %v288_v34 = vmax.f32 %v287_v32, 0.0 }
 0x20c   :  { %289 = vst [vmem:[#allocation8] sm:$0xff] %v288_v34 }
 0x20d   :  { %483 = shalt.err (!%p480_p0)
}
 0x20e   :  { %s484_s10 = scalar_lea.hbm %s603_s5, 128 }
 0x20f   :  { %p485_p1 = scmp.ne.s32.totalorder %s603_s5, %s484_s10  ;;  %p488_p2 = scmp.lt.u32.totalorder %s484_s10, %s603_s5 }
 0x211   :  { %p490_p3 = pnand %p488_p2, %p485_p1 }
 0x213   :  { %493 = shalt.err (!%p490_p3)
}
 0x214   :  { %299 = dma.vmem_to_hbm [thread:$0]  %s297_s8, 128, %s603_s5, [#allocation4]  }
 0x215   :  { %498 = dma.done.wait [#allocation4], 128  }
 0x216   :  { %499 = vsyncadd [#allocation4], 4294967168 }
 0x217   :  { %303 = vsyncpa [#allocation3], 1 }
 0x218   :  { %304 = vsyncpa [#allocation6], 1 }
 0x219   :  { %305 = vsyncpa [#allocation4], 1 }

// kernel: tpu_custom_call.1
= control target key start
LH: loop header
LB: loop body
LE: loop exit
PB: predicated region body
PF: predicated region fallthrough
CT: control target
= control target key end

     0   :  { %10 = vsyncpa [#allocation3], 0  ;;  %s598_s0 = inlined_call_operand.hbm [shape: f32[8,128], index: 0, kind: input, shape index: {}]   ;;  %s599_s1 = inlined_call_operand.hbm [shape: bf16[128,128], index: 1, kind: input, shape index: {}]   ;;  %s600_s2 = inlined_call_operand.vmem [shape: f32[1,128], index: 2, kind: input, shape index: {}]   ;;  %s601_s3 = inlined_call_operand.hbm [shape: bf16[128,128], index: 3, kind: input, shape index: {}]   ;;  %s602_s4 = inlined_call_operand.vmem [shape: f32[1,128], index: 4, kind: input, shape index: {}]   ;;  %s603_s5 = inlined_call_operand.hbm [shape: f32[8,128], index: 5, kind: output, shape index: {}]  }
   0x1   :  { %11 = vsyncpa [#allocation6], 0 }
   0x2   :  { %12 = vsyncpa [#allocation4], 0  ;;  %s500_s18 = smov [#allocation5]   ;;  %s406_s22 = scalar_lea.hbm %s599_s1, 1024 }
   0x3   :  { %s28_s19 = sshll.u32 %s500_s18, 4  ;;  %p407_p0 = scmp.ne.s32.totalorder %s599_s1, %s406_s22  ;;  %s29_s19 = int_to_ptr.vmem [resolvable:$true] %s28_s19 }
   0x4   :  { %p410_p1 = scmp.lt.u32.totalorder %s406_s22, %s599_s1 }
   0x6   :  { %p412_p2 = pnand %p410_p1, %p407_p0 }
   0x8   :  { %415 = shalt.err (!%p412_p2)
}
   0x9   :  { %s416_s27 = scalar_lea.vmem %s29_s19, 1024  ;;  %p421_p4 = scmp.lt.s32.totalorder %s29_s19, %s29_s19 }
   0xa   :  { %p417_p3 = scmp.ne.s32.totalorder %s29_s19, %s416_s27  ;;  %p422_p5 = scmp.lt.s32.totalorder %s416_s27, %s416_s27 }
   0xc   :  { %p423_p6 = por %p422_p5, %p421_p4 }
   0xe   :  { %p424_p7 = pnand %p423_p6, %p417_p3 }
  0x10   :  { %427 = shalt.err (!%p424_p7)
}
  0x11   :  { %s501_s28 = smov 64   ;;  %s502_s29 = smov 4  }
  0x12   :  { %34 = dma.hbm_to_vmem [thread:$0]  %s599_s1, 1024, %s29_s19, [#allocation6], %s501_s28, %s501_s28, %s502_s29  }
  0x13   :  { %s503_s7 = smov [#allocation2]   ;;  %s504_s9 = smov [#allocation7]  }
  0x14   :  { %s19_s8 = sshll.u32 %s503_s7, 4  ;;  %s42_s10 = sshll.u32 %s504_s9, 4  ;;  %s20_s8 = int_to_ptr.vmem [resolvable:$true] %s19_s8  ;;  %s43_s10 = int_to_ptr.vmem [resolvable:$true] %s42_s10 }
  0x15   :  { %s428_s13 = scalar_lea.hbm %s598_s0, 128 }
  0x16   :  { %p429_p8 = scmp.ne.s32.totalorder %s598_s0, %s428_s13  ;;  %p432_p9 = scmp.lt.u32.totalorder %s428_s13, %s598_s0 }
  0x18   :  { %p434_p10 = pnand %p432_p9, %p429_p8 }
  0x1a   :  { %437 = shalt.err (!%p434_p10)
}
  0x1b   :  { %s438_s1 = scalar_lea.vmem %s20_s8, 128  ;;  %p443_p12 = scmp.lt.s32.totalorder %s20_s8, %s20_s8 }
  0x1c   :  { %p439_p11 = scmp.ne.s32.totalorder %s20_s8, %s438_s1  ;;  %p444_p13 = scmp.lt.s32.totalorder %s438_s1, %s438_s1 }
  0x1e   :  { %p445_p0 = por %p444_p13, %p443_p12 }
  0x20   :  { %p446_p1 = pnand %p445_p0, %p439_p11 }
  0x22   :  { %449 = shalt.err (!%p446_p1)
}
  0x23   :  { %22 = dma.hbm_to_vmem [thread:$0]  %s598_s0, 128, %s20_s8, [#allocation3]  }
  0x24   :  { %s450_s22 = scalar_lea.hbm %s601_s3, 1024 }
  0x25   :  { %p451_p2 = scmp.ne.s32.totalorder %s601_s3, %s450_s22  ;;  %p454_p3 = scmp.lt.u32.totalorder %s450_s22, %s601_s3 }
  0x27   :  { %p456_p4 = pnand %p454_p3, %p451_p2 }
  0x29   :  { %459 = shalt.err (!%p456_p4)
}
  0x2a   :  { %s460_s27 = scalar_lea.vmem %s43_s10, 1024  ;;  %p465_p6 = scmp.lt.s32.totalorder %s43_s10, %s43_s10 }
  0x2b   :  { %p461_p5 = scmp.ne.s32.totalorder %s43_s10, %s460_s27  ;;  %p466_p7 = scmp.lt.s32.totalorder %s460_s27, %s460_s27 }
  0x2d   :  { %p467_p8 = por %p466_p7, %p465_p6 }
  0x2f   :  { %p468_p9 = pnand %p467_p8, %p461_p5 }
  0x31   :  { %471 = shalt.err (!%p468_p9)
}
  0x32   :  { %48 = dma.hbm_to_vmem [thread:$0]  %s601_s3, 1024, %s43_s10, [#allocation6], %s501_s28, %s501_s28, %s502_s29  }
  0x33   :  { %494 = dma.done.wait [#allocation3], 128  }
  0x34   :  { %495 = vsyncadd [#allocation3], 4294967168 }
  0x35   :  { %496 = dma.done.wait [#allocation6], 2048  }
  0x36   :  { %497 = vsyncadd [#allocation6], 4294965248  ;;  %v505_v0 = vmov 0.0   ;;  %vm506_vm0 = vmmov 0   ;;  %v390_v1 = vld [vmem:[#allocation5] sm:$0xff]   ;;  %v391_v2 = vld [vmem:[#allocation5 + $0x8] sm:$0xff]  }
  0x37   :  { %342 = vmatprep.subr.bf16.mxu0 %v505_v0  ;;  %358 = vmatprep.mubr.msk.bf16.mxu0 %vm506_vm0, %v505_v0  ;;  %v392_v3 = vld [vmem:[#allocation5 + $0x10] sm:$0xff]   ;;  %v398_v4 = vld [vmem:[#allocation7] sm:$0xff]   ;;  %v393_v5 = vld [vmem:[#allocation5 + $0x18] sm:$0xff]   ;;  %s507_s7 = smov [#allocation8]  }
  0x38   :  { %362 = vmatprep.subr.bf16.mxu1 %v505_v0  ;;  %378 = vmatprep.mubr.msk.bf16.mxu1 %vm506_vm0, %v505_v0  ;;  %v399_v6 = vld [vmem:[#allocation7 + $0x8] sm:$0xff]   ;;  %v394_v7 = vld [vmem:[#allocation5 + $0x20] sm:$0xff]   ;;  %v400_v8 = vld [vmem:[#allocation7 + $0x10] sm:$0xff]   ;;  %s296_s8 = sshll.u32 %s507_s7, 4  ;;  %s297_s8 = int_to_ptr.vmem [resolvable:$true] %s296_s8 }
  0x39   :  { %343 = vmatpush3.bf16.msra.mxu0 %v390_v1  ;;  %363 = vmatpush3.bf16.msra.mxu1 %v398_v4  ;;  %v395_v9 = vld [vmem:[#allocation5 + $0x28] sm:$0xff]   ;;  %v401_v10 = vld [vmem:[#allocation7 + $0x18] sm:$0xff]   ;;  %v396_v11 = vld [vmem:[#allocation5 + $0x30] sm:$0xff]   ;;  %p477_p11 = scmp.lt.s32.totalorder %s297_s8, %s297_s8 }
  0x3a   :  { %344 = vmatprep.subr.bf16.mxu0 %v505_v0  ;;  %364 = vmatprep.subr.bf16.mxu1 %v505_v0  ;;  %v402_v12 = vld [vmem:[#allocation7 + $0x20] sm:$0xff]   ;;  %v397_v13 = vld [vmem:[#allocation5 + $0x38] sm:$0xff]   ;;  %v403_v15 = vld [vmem:[#allocation7 + $0x28] sm:$0xff]  }
  0x3b   :  { %v61_v14 = vld [vmem:[#allocation2] sm:$0xff]  ;;  %v404_v17 = vld [vmem:[#allocation7 + $0x30] sm:$0xff]  }
  0x3c   :  { %v62_v16 = vpack.c.bf16 %v61_v14, %v61_v14  ;;  %v405_v18 = vld [vmem:[#allocation7 + $0x38] sm:$0xff]  }
  0x3d   :  { %345 = vmatpush3.bf16.msra.mxu0 %v391_v2  ;;  %365 = vmatpush3.bf16.msra.mxu1 %v399_v6  ;;  %v306_v19 = vld [vmem:[%s600_s2] ss:$0 sm:$0xff]  ;;  %s472_s2 = scalar_lea.vmem %s297_s8, 128 }
  0x3e   :  { %346 = vmatprep.subr.bf16.mxu0 %v505_v0  ;;  %366 = vmatprep.subr.bf16.mxu1 %v505_v0  ;;  %v315_v27 = vld [vmem:[%s602_s4] ss:$0 sm:$0xff]  ;;  %p473_p10 = scmp.ne.s32.totalorder %s297_s8, %s472_s2  ;;  %p478_p12 = scmp.lt.s32.totalorder %s472_s2, %s472_s2 }
  0x40   :  { %p479_p13 = por %p478_p12, %p477_p11 }
  0x41   :  { %347 = vmatpush3.bf16.msra.mxu0 %v392_v3  ;;  %367 = vmatpush3.bf16.msra.mxu1 %v400_v8 }
  0x42   :  { %348 = vmatprep.subr.bf16.mxu0 %v505_v0  ;;  %368 = vmatprep.subr.bf16.mxu1 %v505_v0  ;;  %p480_p0 = pnand %p479_p13, %p473_p10 }
  0x45   :  { %349 = vmatpush3.bf16.msra.mxu0 %v393_v5  ;;  %369 = vmatpush3.bf16.msra.mxu1 %v401_v10 }
  0x46   :  { %350 = vmatprep.subr.bf16.mxu0 %v505_v0  ;;  %370 = vmatprep.subr.bf16.mxu1 %v505_v0 }
  0x49   :  { %351 = vmatpush3.bf16.msra.mxu0 %v394_v7  ;;  %371 = vmatpush3.bf16.msra.mxu1 %v402_v12 }
  0x4a   :  { %352 = vmatprep.subr.bf16.mxu0 %v505_v0  ;;  %372 = vmatprep.subr.bf16.mxu1 %v505_v0 }
  0x4d   :  { %353 = vmatpush3.bf16.msra.mxu0 %v395_v9  ;;  %373 = vmatpush3.bf16.msra.mxu1 %v403_v15 }
  0x4e   :  { %354 = vmatprep.subr.bf16.mxu0 %v505_v0  ;;  %374 = vmatprep.subr.bf16.mxu1 %v505_v0 }
  0x51   :  { %355 = vmatpush3.bf16.msra.mxu0 %v396_v11  ;;  %375 = vmatpush3.bf16.msra.mxu1 %v404_v17 }
  0x52   :  { %356 = vmatprep.subr.bf16.mxu0 %v505_v0  ;;  %376 = vmatprep.subr.bf16.mxu1 %v505_v0 }
  0x55   :  { %357 = vmatpush3.bf16.msra.mxu0 %v397_v13  ;;  %377 = vmatpush3.bf16.msra.mxu1 %v405_v18 }
  0x58   :  { %359 = vmatmul.mubr.bf16.vlgmr.msra.gmra.mrb[0].mxu0 %v62_v16 }
 0x12b   :  { %v168_v20 = vpop.f32.mrb[0].mxu0 }
 0x12c   :  { %v169_v21 = vadd.f32 %v306_v19, %v168_v20  ;;  %v360_v22 = vpop.f32.mrb[1].mxu0 }
 0x12d   :  { %v171_v23 = vpop.f32.mrb[2].mxu0 }
 0x12e   :  { %v174_v24 = vmax.f32 %v169_v21, 0.0  ;;  %v361_v25 = vpop.f32.mrb[3].mxu0 }
 0x130   :  { %v175_v26 = vpack.c.bf16 %v174_v24, %v174_v24 }
 0x132   :  { %379 = vmatmul.mubr.bf16.vlgmr.msra.gmra.mrb[0].mxu1 %v175_v26 }
 0x205   :  { %v281_v28 = vpop.f32.mrb[0].mxu1 }
 0x206   :  { %v282_v29 = vadd.f32 %v315_v27, %v281_v28  ;;  %v380_v30 = vpop.f32.mrb[1].mxu1 }
 0x207   :  { %v284_v31 = vpop.f32.mrb[2].mxu1 }
 0x208   :  { %v287_v32 = vadd.f32 %v282_v29, %v61_v14  ;;  %v381_v33 = vpop.f32.mrb[3].mxu1 }
 0x20a   :  { %v288_v34 = vmax.f32 %v287_v32, 0.0 }
 0x20c   :  { %289 = vst [vmem:[#allocation8] sm:$0xff] %v288_v34 }
 0x20d   :  { %483 = shalt.err (!%p480_p0)
}
 0x20e   :  { %s484_s10 = scalar_lea.hbm %s603_s5, 128 }
 0x20f   :  { %p485_p1 = scmp.ne.s32.totalorder %s603_s5, %s484_s10  ;;  %p488_p2 = scmp.lt.u32.totalorder %s484_s10, %s603_s5 }
 0x211   :  { %p490_p3 = pnand %p488_p2, %p485_p1 }
 0x213   :  { %493 = shalt.err (!%p490_p3)
}
 0x214   :  { %299 = dma.vmem_to_hbm [thread:$0]  %s297_s8, 128, %s603_s5, [#allocation4]  }
 0x215   :  { %498 = dma.done.wait [#allocation4], 128  }
 0x216   :  { %499 = vsyncadd [#allocation4], 4294967168 }
 0x217   :  { %303 = vsyncpa [#allocation3], 1 }
 0x218   :  { %304 = vsyncpa [#allocation6], 1 }
 0x219   :  { %305 = vsyncpa [#allocation4], 1 }

</bundles_post_ra>
